<compile_context>
chip_gen: v7x
topology: tpu7x:2x2x1
jax: 0.10.0
libtpu: 0.0.40
codegen_flags: <defaults>
</compile_context>

<pallas_src>
import math

import jax
import jax.numpy as jnp
from jax.experimental import pallas as pl
from jax.experimental.pallas import tpu as pltpu


def token_embedding_kernel(x_ref, w_ref, o_ref):
    """One grid step of the tap-fused GEMM.

    x_ref: (TM, 3*C)  im2col row tile (3 circular taps fused along channels)
    w_ref: (3*C, D)   fused per-tap weights, tap-major along K (VMEM-resident)
    o_ref: (TM, D)    output row tile
    """
    acc = jnp.dot(x_ref[...], w_ref[...], preferred_element_type=jnp.float32)
    o_ref[...] = acc.astype(o_ref.dtype)


def _pick_row_tile(M, D, itemsize, target_out_bytes=4 << 20, max_tile=4096):
    """Row tile so the output tile is ~2-4 MiB, multiple of 256, capped at 4096.

    For small problems, shrink so the grid has >=2 steps (v7x megacore)."""
    tm = target_out_bytes // max(1, D * itemsize)
    tm = max(256, min(max_tile, (tm // 256) * 256))
    m_pad = ((M + 7) // 8) * 8
    if tm >= m_pad:
        tm = m_pad
        if m_pad >= 16:
            # Split into (at least) two steps so both v7x TensorCores get work.
            tm = ((((m_pad + 1) // 2) + 7) // 8) * 8
    return int(tm)


def token_embedding(x, weight, *, compute_dtype=None):
    """x: (B, L, c_in); weight: (d_model, c_in, 3) (PyTorch Conv1d layout)."""
    B, L, C = x.shape
    D = weight.shape[0]
    out_dtype = x.dtype

    # Single-pass im2col with circular taps:
    #   x_unf[b, l, k*C + c] = x[b, (l + k - 1) mod L, c],  k in {0,1,2}
    x_unf = jnp.concatenate(
        [jnp.roll(x, 1, axis=1), x, jnp.roll(x, -1, axis=1)], axis=-1)   # (B, L, 3C)
    x_unf = x_unf.reshape(B * L, 3 * C)                                  # (M, 3C)

    # weight (D, C, 3) -> (3, C, D) -> (3C, D); tap-major K matches x_unf layout.
    w2 = jnp.transpose(weight, (2, 1, 0)).reshape(3 * C, D)

    if compute_dtype is not None:
        # Optional bf16 inputs on v6e/v7x (dot still accumulates in f32).
        x_unf = x_unf.astype(compute_dtype)
        w2 = w2.astype(compute_dtype)

    M = B * L
    itemsize = jnp.dtype(x_unf.dtype).itemsize
    TM = _pick_row_tile(M, D, itemsize)
    grid = (pl.cdiv(M, TM),)

    # Explicit VMEM budget from the chosen tiles: double-buffered input and output
    # tiles + the resident weight, with slack; clamped to fit every generation.
    buf_bytes = 2 * TM * (3 * C + D) * itemsize + 2 * (3 * C) * D * itemsize
    vmem_limit = int(min(64 << 20, max(16 << 20, 2 * buf_bytes + (4 << 20))))

    out = pl.pallas_call(
        token_embedding_kernel,
        out_shape=jax.ShapeDtypeStruct((M, D), out_dtype),
        grid_spec=pltpu.PrefetchScalarGridSpec(
            num_scalar_prefetch=0,
            grid=grid,
            in_specs=[
                pl.BlockSpec((TM, 3 * C), lambda i: (i, 0)),
                pl.BlockSpec((3 * C, D), lambda i: (0, 0)),   # resident weights
            ],
            out_specs=pl.BlockSpec((TM, D), lambda i: (i, 0)),
        ),
        compiler_params=pltpu.CompilerParams(
            dimension_semantics=("parallel",),
            vmem_limit_bytes=vmem_limit,
        ),
    )(x_unf, w2)
    return out.reshape(B, L, D)


def token_embedding_ref(x, weight):
    """Pure-JAX reference (matches PyTorch TokenEmbedding.forward)."""
    B, L, C = x.shape
    D = weight.shape[0]
    x_pad = jnp.concatenate([x[:, -1:, :], x, x[:, :1, :]], axis=1)   # (B, L+2, C)
    out = jnp.zeros((B, L, D), dtype=jnp.float32)
    for k in range(3):
        out = out + jnp.einsum("blc,dc->bld", x_pad[:, k:k + L, :], weight[:, :, k])
    return out.astype(x.dtype)


if __name__ == "__main__":
    B, L, c_in, d_model = 2, 8, 4, 32

    key = jax.random.PRNGKey(0)
    kx, kw = jax.random.split(key)

    x = jax.random.normal(kx, (B, L, c_in), dtype=jnp.float32)

    # Deterministic Kaiming-normal init (mode='fan_in', nonlinearity='leaky_relu'):
    #   gain = sqrt(2), fan_in = c_in * kernel_size, std = gain / sqrt(fan_in)
    fan_in = c_in * 3
    std = math.sqrt(2.0) / math.sqrt(fan_in)
    weight = std * jax.random.normal(kw, (d_model, c_in, 3), dtype=jnp.float32)

    out = token_embedding(x, weight)
    out = jax.block_until_ready(out)

    ref = token_embedding_ref(x, weight)
    assert out.shape == (B, L, d_model), out.shape
    assert jnp.allclose(out, ref, rtol=1e-5, atol=1e-5), float(jnp.max(jnp.abs(out - ref)))

    print("KERNEL_OK")
</pallas_src>

<mosaic_0001>
module attributes {stable_mosaic.version = 11 : i64} {
  func.func @token_embedding_kernel(%arg0: i32, %arg1: memref<8x12xf32, #tpu.memory_space<vmem>>, %arg2: memref<12x32xf32, #tpu.memory_space<vmem>>, %arg3: memref<8x32xf32, #tpu.memory_space<vmem>>) attributes {dimension_semantics = [#tpu.dimension_semantics<parallel>], iteration_bounds = array<i64: 2>, scalar_prefetch = 0 : i64, scratch_operands = 0 : i64, tpu.core_type = #tpu.core_type<tc>, window_params = [{transform_indices = @transform_0, window_bounds = array<i64: 8, 12>}, {pipeline_mode = #tpu.pipeline_mode<synchronous>, transform_indices = @transform_1, window_bounds = array<i64: 12, 32>}, {transform_indices = @transform_2, window_bounds = array<i64: 8, 32>}]} {
    %c0 = arith.constant 0 : index
    %c0_0 = arith.constant 0 : index
    %0 = vector.load %arg1[%c0, %c0_0] : memref<8x12xf32, #tpu.memory_space<vmem>>, vector<8x12xf32>
    %c0_1 = arith.constant 0 : index
    %c0_2 = arith.constant 0 : index
    %1 = vector.load %arg2[%c0_1, %c0_2] : memref<12x32xf32, #tpu.memory_space<vmem>>, vector<12x32xf32>
    %cst = arith.constant dense<0.000000e+00> : vector<8x32xf32>
    %2 = tpu.matmul %0, %1, %cst {dimension_numbers = #tpu.dot_dimension_numbers<[1], [0], [0], [1], [0, 0, 1, 1], [], []>} : vector<8x12xf32>, vector<12x32xf32>, vector<8x32xf32> -> vector<8x32xf32>
    %c0_3 = arith.constant 0 : index
    %c0_4 = arith.constant 0 : index
    %3 = vector.load %arg3[%c0_3, %c0_4] : memref<8x32xf32, #tpu.memory_space<vmem>>, vector<8x32xf32>
    tpu.vector_store %arg3[%c0_3, %c0_4], %2 {strides = array<i32>} : memref<8x32xf32, #tpu.memory_space<vmem>>, vector<8x32xf32>,
    return
  }
  func.func @transform_0(%arg0: i32) -> (i32, i32) {
    %c0_i32 = arith.constant 0 : i32
    %c0_i32_0 = arith.constant 0 : i32
    return %arg0, %c0_i32 : i32, i32
  }
  func.func @transform_1(%arg0: i32) -> (i32, i32) {
    %c0_i32 = arith.constant 0 : i32
    %c0_i32_0 = arith.constant 0 : i32
    %c0_i32_1 = arith.constant 0 : i32
    return %c0_i32, %c0_i32_0 : i32, i32
  }
  func.func @transform_2(%arg0: i32) -> (i32, i32) {
    %c0_i32 = arith.constant 0 : i32
    %c0_i32_0 = arith.constant 0 : i32
    return %arg0, %c0_i32 : i32, i32
  }
}

</mosaic_0001>

<bundles_post_ra>
// kernel: tpu_custom_call.1
= control target key start
LH: loop header
LB: loop body
LE: loop exit
PB: predicated region body
PF: predicated region fallthrough
CT: control target
= control target key end

     0   :  { %7 = vsyncpa [#allocation3], 0  ;;  %s794_s0 = inlined_call_operand.hbm [shape: f32[16,12], index: 0, kind: input, shape index: {}]   ;;  %s795_s1 = inlined_call_operand.hbm [shape: f32[12,32], index: 1, kind: input, shape index: {}]   ;;  %s796_s2 = inlined_call_operand.hbm [shape: f32[16,32], index: 2, kind: output, shape index: {}]  }
   0x1   :  { %9 = vsyncpa [#allocation3 + $0x1], 0 }
   0x2   :  { %10 = vsyncpa [#allocation6], 0 }
   0x3   :  { %11 = vsyncpa [#allocation4], 0 }
   0x4   :  { %13 = vsyncpa [#allocation4 + $0x1], 0  ;;  %s598_s9 = smov 0   ;;  %s600_s10 = smov 0  }
   0x5   :  { %s602_s11 = smov 0   ;;  %s604_s12 = smov 0  }
   0x6 LB: > { %s619_s13 = sadd.s32 4294967295, %s572_s12   ;;  %s351_s14 = sadd.s32 4294967294, %s572_s12   ;;  %s572_s12 = sphi %s604_s12, %s816_s12   ;;  %s568_s11 = sphi %s602_s11, %s815_s11   ;;  %s564_s10 = sphi %s600_s10, %s814_s10   ;;  %s560_s9 = sphi %s598_s9, %s813_s9  }
   0x7   : > { %p39_p0 = scmp.ne.s32.totalorder %s564_s10, %s560_s9  ;;  %p797_p1 = scmp.eq.s32.totalorder %s619_s13, 0 }
   0x8   : > { %p90_p3 = scmp.eq.s32.totalorder %s351_s14, 1  ;;  %p352_p5 = scmp.ge.s32.totalorder %s572_s12, 1 }
   0x9   : > { %p628_p4 = por %p797_p1, %p39_p0  ;;  %p97_p7 = scmp.lt.s32.totalorder %s572_s12, 3 }
   0xa   : > { %p633_p6 = por %p90_p3, %p39_p0  ;;  %s574_s18 = smov [#allocation5]  }
   0xb   : > { %s800_s15 = scalar_select %p628_p4, 1, 0 }
   0xc   : > { %s801_s16 = scalar_select %p633_p6, 1, 0 }
   0xd   : > { %p638_p8 = pnand %p352_p5, %p97_p7  ;;  %s109_s19 = sshll.u32 %s574_s18, 4  ;;  %s642_s19 = int_to_ptr.vmem [resolvable:$true] %s109_s19 }
   0xe   : > { %s654_s21 = sadd.s32 1, %s572_s12   ;;  %s26_s22 = sadd.s32 1, %s568_s11 }
   0xf   : > { %s802_s17 = scalar_select %p638_p8, 1, 0 }
  0x10   : > { %p389_p9 = pneg %p638_p8  ;;  %s23_s23 = ssub.s32 %s572_s12, %s654_s21 }
  0x11   : > { %s444_s26 = scalar_lea.hbm %s795_s1, 256 }
  0x12   : > { %p649_p11 = pnand %p389_p9, %p797_p1  ;;  %p445_p12 = scmp.ne.s32.totalorder %s795_s1, %s444_s26 }
  0x13   : > { %p451_p5 = scmp.lt.u32.totalorder %s444_s26, %s795_s1 }
  0x14   : > { %p446_p13 = pneg %p649_p11 }
  0x16   : > { %p447_p0 = pnand %p446_p13, %p445_p12 }
  0x18   : > { %p448_p3 = pneg %p447_p0 }
  0x1a   : > { %p453_p7 = pnand %p451_p5, %p448_p3 }
  0x1c   : > { %456 = shalt.err (!%p453_p7)
}
  0x1d   : > { %s457_s3 = scalar_lea.vmem %s642_s19, 256  ;;  %p465_p2 = scmp.lt.s32.totalorder %s642_s19, %s642_s19 }
  0x1e   : > { %p458_p9 = scmp.ne.s32.totalorder %s642_s19, %s457_s3  ;;  %p466_p6 = scmp.lt.s32.totalorder %s457_s3, %s457_s3 }
  0x20   : > { %p460_p10 = pnand %p458_p9, %p446_p13  ;;  %p467_p4 = por %p466_p6, %p465_p2 }
  0x22   : > { %p461_p1 = pneg %p460_p10 }
  0x24   : > { %p468_p8 = pnand %p467_p4, %p461_p1 }
  0x26   : > { %471 = shalt.err (!%p468_p8)
}
  0x27   : > { %s575_s4 = smov 128   ;;  %s576_s5 = smov 8  }
  0x28   : > { %392 = dma.hbm_to_vmem [thread:$0]  (!%p649_p11), %s795_s1, 256, %s642_s19, [#allocation6], %s575_s4, %s575_s4, %s576_s5  }
  0x29   : > { %p24_p2 = scmp.eq.s32.totalorder %s23_s23, 0  ;;  %p33_p1 = scmp.ne.s32.totalorder %s568_s11, %s564_s10 }
  0x2a   : > { %p34_p4 = scmp.eq.s32.totalorder %s572_s12, 0  ;;  %p402_p6 = scmp.lt.s32.totalorder %s572_s12, 2 }
  0x2b   : > { %s685_s8 = scalar_select %p24_p2, %s568_s11, %s26_s22  }
  0x2c   : > { %p35_p8 = por %p34_p4, %p33_p1  ;;  %p804_p10 = scmp.eq.s32.totalorder %s619_s13, 1 }
  0x2d   : > { %s123_s18 = sand.u32 1, %s568_s11   ;;  %s356_s24 = sshll.u32 %s572_s12, 7 }
  0x2e   : > { %p689_p12 = por %p804_p10, %p33_p1  ;;  %s355_s25 = sshll.u32 %s123_s18, 3 }
  0x2f   : > { %s698_s27 = scalar_lea.hbm %s794_s0, %s356_s24  ;;  %s127_s19 = scalar_lea.vmem [#allocation2], %s355_s25 }
  0x30   : > { %s134_s22 = sshll.u32 %s127_s19, 4  ;;  %p700_p11 = pnand %p402_p6, %p35_p8  ;;  %s704_s22 = int_to_ptr.vmem [resolvable:$true] %s134_s22 }
  0x31   : > { %s124_s28 = scalar_lea.sflag [#allocation3], %s123_s18  ;;  %s472_s29 = scalar_lea.hbm %s698_s27, 128 }
  0x32   : > { %p473_p13 = scmp.ne.s32.totalorder %s698_s27, %s472_s29  ;;  %p474_p0 = pneg %p700_p11 }
  0x33   : > { %s477_s4 = scalar_lea.hbm %s794_s0, 256  ;;  %p478_p7 = scmp.lt.u32.totalorder %s698_s27, %s794_s0 }
  0x34   : > { %p475_p3 = pnand %p474_p0, %p473_p13  ;;  %p479_p9 = scmp.lt.u32.totalorder %s477_s4, %s472_s29 }
  0x35   : > { %p481_p1 = scmp.lt.u32.totalorder %s472_s29, %s698_s27 }
  0x36   : > { %p476_p5 = pneg %p475_p3  ;;  %p480_p2 = por %p479_p9, %p478_p7 }
  0x38   : > { %p482_p4 = por %p481_p1, %p480_p2 }
  0x3a   : > { %p483_p6 = pnand %p482_p4, %p476_p5 }
  0x3c   : > { %486 = shalt.err (!%p483_p6)
}
  0x3d   : > { %s487_s7 = scalar_lea.vmem %s704_s22, 128  ;;  %s577_s18 = smov [#allocation2]  }
  0x3e   : > { %p488_p8 = scmp.ne.s32.totalorder %s704_s22, %s487_s7  ;;  %s492_s24 = sshll.u32 %s577_s18, 4  ;;  %s493_s24 = int_to_ptr.vmem [resolvable:$false] %s492_s24 }
  0x3f   : > { %s494_s25 = scalar_lea.vmem %s493_s24, 256  ;;  %p495_p3 = scmp.lt.s32.totalorder %s704_s22, %s493_s24 }
  0x40   : > { %p490_p10 = pnand %p488_p8, %p474_p0  ;;  %p496_p7 = scmp.lt.s32.totalorder %s494_s25, %s487_s7 }
  0x42   : > { %p491_p13 = pneg %p490_p10  ;;  %p497_p9 = por %p496_p7, %p495_p3 }
  0x44   : > { %p498_p2 = pnand %p497_p9, %p491_p13 }
  0x46   : > { %501 = shalt.err (!%p498_p2)
}
  0x47   : > { %396 = dma.hbm_to_vmem [thread:$0]  (!%p700_p11), %s698_s27, 128, %s704_s22, %s124_s28  }
  0x48   : > { %p807_p5 = scmp.ne.s32.totalorder %s802_s17, 0 }
  0x49   : > { %s734_s20 = sand.u32 (!%p807_p5), 1, %s564_s10   ;;  %p808_p0 = scmp.ne.s32.totalorder (!%p807_p5), %s800_s15, 0 }
  0x4a   : > { %143 = sbr.rel (%p807_p5) target bundleno = 318 (0x13e), region = 28  ;;  %s358_s26 = sshll.u32 (!%p807_p5), %s734_s20, 3 }
  0x4b   : > { %s146_s19 = scalar_lea.sflag (!%p807_p5), [#allocation3], %s734_s20  ;;  %s149_s29 = scalar_lea.vmem (!%p807_p5), [#allocation2], %s358_s26 }
  0x51   : > { %547 = dma.done.wait (%p808_p0), %s146_s19, 128  }
  0x52   : > { %549 = vsyncadd (%p808_p0), %s146_s19, 4294967168  ;;  %p809_p1 = scmp.eq.s32.totalorder %s619_s13, 0 }
  0x54   : > { %551 = dma.done.wait (%p809_p1), [#allocation6], 256   ;;  %p810_p11 = pmov %p809_p1 }
  0x55   : > { %v578_v0 = vmov 0.0|0.0   ;;  %vm579_vm0 = vmmov 0   ;;  %v580_v1 = vmov 0.0   ;;  %vm181_vm1 = vcmask 1043456   ;;  %v175_v2 = vld [vmem:[#allocation5] sm:$0xff]  ;;  %v174_v5 = vld [vmem:[%s149_s29] sm:$0xff] }
  0x56   : > { %553 = vsyncadd (%p810_p11), [#allocation6], 4294967040  ;;  %377 = vmatprep.subr.bf16.mxu0 %v578_v0  ;;  %374 = vmatprep.mubr.msk.f32.mxu0 %vm579_vm0, %v580_v1  ;;  %v176_v3 = vld [vmem:[#allocation5 + $0x8] sm:$0xf]  ;;  %vm581_vm2 = vmmov 1   ;;  %vm177_vm4 = vcmask 97280  }
  0x57   : > { %vm379_vm3 = vmpackc.low %vm181_vm1, %vm581_vm2  ;;  %v378_v4 = vpack.c.bf16 %v176_v3, %v175_v2  ;;  %s364_s15 = sshll.u32 %s619_s13, 7  ;;  %s173_s17 = scalar_lea.vmem [#allocation7], %s358_s26  ;;  %vm255_vm5 = vcmask 261120  }
  0x58   : > { %s271_s27 = sshll.u32 %s173_s17, 4  ;;  %s750_s28 = scalar_lea.hbm %s796_s2, %s364_s15  ;;  %s752_s27 = int_to_ptr.vmem [resolvable:$true] %s271_s27 }
  0x59   : > { %380 = vmatpush3.bf16.msk.msra.mxu0 %vm379_vm3, %v378_v4  ;;  %s258_s30 = scalar_lea.sflag [#allocation4], %s734_s20  ;;  %s502_s3 = scalar_lea.vmem %s752_s27, 128 }
  0x5a   : > { %p503_p4 = scmp.ne.s32.totalorder %s752_s27, %s502_s3  ;;  %s582_s13 = smov [#allocation7]  }
  0x5b   : > { %s506_s4 = sshll.u32 %s582_s13, 4  ;;  %s507_s4 = int_to_ptr.vmem [resolvable:$false] %s506_s4 }
  0x5c   : > { %375 = vmatmul.mubr.msk.f32.vlgmr.msra.gmra.mrb[0].mxu0 %vm177_vm4, %v174_v5  ;;  %p504_p6 = pnand %p503_p4, %p689_p12  ;;  %s508_s5 = scalar_lea.vmem %s507_s4, 256 }
  0x5d   : > { %p509_p10 = scmp.lt.s32.totalorder %s752_s27, %s507_s4  ;;  %p510_p13 = scmp.lt.s32.totalorder %s508_s5, %s502_s3 }
  0x5e   : > { %p505_p8 = pneg %p504_p6 }
  0x5f   : > { %p511_p3 = por %p510_p13, %p509_p10 }
  0x61   : > { %p512_p7 = pnand %p511_p3, %p505_p8 }
 0x12f   : > { %v251_v6 = vpop.f32.mrb[0].mxu0 }
 0x130   : > { %256 = vst.msk [vmem:[%s173_s17] sm:$0xff] %vm255_vm5, %v251_v6  ;;  %v376_v7 = vpop.f32.mrb[1].mxu0 }
 0x131   : > { %515 = shalt.err (!%p512_p7)
}
 0x132   : > { %s516_s6 = scalar_lea.hbm %s750_s28, 128  ;;  %s520_s24 = scalar_lea.hbm %s796_s2, 256 }
 0x133   : > { %p517_p9 = scmp.ne.s32.totalorder %s750_s28, %s516_s6  ;;  %p521_p0 = scmp.lt.u32.totalorder %s750_s28, %s796_s2 }
 0x134   : > { %p522_p1 = scmp.lt.u32.totalorder %s520_s24, %s516_s6  ;;  %p524_p4 = scmp.lt.u32.totalorder %s516_s6, %s750_s28 }
 0x135   : > { %p518_p2 = pnand %p517_p9, %p689_p12 }
 0x136   : > { %p523_p11 = por %p522_p1, %p521_p0 }
 0x137   : > { %p519_p5 = pneg %p518_p2 }
 0x138   : > { %p525_p6 = por %p524_p4, %p523_p11 }
 0x13a   : > { %p526_p8 = pnand %p525_p6, %p519_p5 }
 0x13c   : > { %529 = shalt.err (!%p526_p8)
}
 0x13d   : > { %387 = dma.vmem_to_hbm [thread:$0]  (%p689_p12), %s752_s27, 128, %s750_s28, %s258_s30  }
 0x13e PF: > { %s283_s26 = sand.u32 1, %s560_s9   ;;  %p811_p10 = scmp.ne.s32.totalorder %s801_s16, 0 }
 0x13f   : > { %p812_p13 = scmp.ge.s32.totalorder %s572_s12, 2  ;;  %s284_s19 = scalar_lea.sflag [#allocation4], %s283_s26 }
 0x141   : > { %p398_p3 = pnand %p812_p13, %p811_p10 }
 0x143   : > { %555 = dma.done.wait (!%p398_p3), %s284_s19, 128  }
 0x144   : > { %557 = vsyncadd (!%p398_p3), %s284_s19, 4294967168  ;;  %p16_p7 = scmp.ge.s32.totalorder %s654_s21, 4   ;;  %s813_s9 = smov %s564_s10 }
 0x145   : > { %s814_s10 = smov %s568_s11  ;;  %s815_s11 = smov %s685_s8 }
 0x146   : > { %s816_s12 = smov %s654_s21  ;;  %18 = sbr.rel (!%p16_p7) target bundleno = 6 (0x6), region = 77 }
 0x14d   :  { %289 = vsyncpa [#allocation3], 1 }
 0x14e   :  { %291 = vsyncpa [#allocation3 + $0x1], 1 }
 0x14f   :  { %292 = vsyncpa [#allocation6], 1 }
 0x150   :  { %293 = vsyncpa [#allocation4], 1 }
 0x151   :  { %295 = vsyncpa [#allocation4 + $0x1], 1 }

</bundles_post_ra>
